<compile_context>
chip_gen: v7x
topology: tpu7x:2x2x1
jax: 0.10.0
libtpu: 0.0.40
codegen_flags: <defaults>
</compile_context>

<pallas_src>
import functools

import jax
import jax.numpy as jnp
from jax import lax
from jax.experimental import pallas as pl
from jax.experimental.pallas import tpu as pltpu

VMEM = pltpu.MemorySpace.VMEM


# ------------------------------ fused kernel ------------------------------- #

def _fused_forward_kernel(
    user_x_ref, content_x_ref,   # (nu_p, Fu), (nc_p, Fc) padded raw node features
    wu_ref, wc_ref,              # input linear weights, (Fu, H) / (Fc, H)
    ube_ref, cbe_ref,            # (bias + embedding) tables, (nu_p, H) / (nc_p, H)
    eidx_ref,                    # (2, E_p) int32 message-edge indices, pad = -1
    lidx_ref,                    # (2, L_p) int32 label-edge indices, pad = -1
    w_ref,                       # (4, 2H, H) stacked [W_l^T ; W_r^T] per SAGEConv
    b_ref,                       # (4, 1, H) stacked lin_l biases
    o_ref,                       # (1, L_p) predictions (lane-dense)
):
    f32 = jnp.float32
    nu = ube_ref.shape[0]
    nc = cbe_ref.shape[0]
    ne = eidx_ref.shape[1]
    nlab = lidx_ref.shape[1]
    h = wu_ref.shape[1]

    # ---- mean-aggregation adjacencies from the edge list --------------------
    # Padded edge slots carry index -1 so they never match any iota value.
    eidx = eidx_ref[...]
    eu_row = eidx[0:1, :]                      # (1, ne) user index per edge
    ec_row = eidx[1:2, :]                      # (1, ne) content index per edge
    u_oh = (lax.broadcasted_iota(jnp.int32, (nu, ne), 0) == eu_row).astype(f32)
    c_oh = (lax.broadcasted_iota(jnp.int32, (nc, ne), 0) == ec_row).astype(f32)

    dn = (((1,), (1,)), ((), ()))              # contract last (edge / H) axis of both
    cnt_uc = lax.dot_general(u_oh, c_oh, dn, preferred_element_type=f32)   # (nu, nc)
    cnt_cu = lax.dot_general(c_oh, u_oh, dn, preferred_element_type=f32)   # (nc, nu)
    a_uc = cnt_uc / jnp.maximum(jnp.sum(cnt_uc, axis=1, keepdims=True), 1.0)
    a_cu = cnt_cu / jnp.maximum(jnp.sum(cnt_cu, axis=1, keepdims=True), 1.0)

    # ---- input projections (linear bias pre-folded into embedding table) ----
    xu = jnp.dot(user_x_ref[...], wu_ref[...], preferred_element_type=f32) + ube_ref[...]
    xc = jnp.dot(content_x_ref[...], wc_ref[...], preferred_element_type=f32) + cbe_ref[...]

    # ---- SAGEConv ('mean'): agg @ W_l^T + x_dst @ W_r^T + b_l ----------------
    # Static sublane slices of the stacked weight avoid a lane-axis concat.
    def sage(adj, x_src, x_dst, idx, relu):
        w = w_ref[idx]                                               # (2H, H)
        agg = jnp.dot(adj, x_src, preferred_element_type=f32)
        out = (jnp.dot(agg, w[:h, :], preferred_element_type=f32)
               + jnp.dot(x_dst, w[h:, :], preferred_element_type=f32)
               + b_ref[idx])
        return jnp.maximum(out, 0.0) if relu else out

    xu1 = sage(a_uc, xc, xu, 0, True)    # rev edge type (dst = user)
    xc1 = sage(a_cu, xu, xc, 1, True)    # fwd edge type (dst = content)
    xu2 = sage(a_uc, xc1, xu1, 2, False)
    xc2 = sage(a_cu, xu1, xc1, 3, False)
    # Dropout: eval-mode identity.
    # TODO(synk): training-mode dropout (random mask + 1/(1-p) scale) not implemented.

    # ---- classifier: Gram matrix + lane-dense one-hot selection --------------
    lidx = lidx_ref[...]
    lu_row = lidx[0:1, :]                      # (1, nlab)
    lc_row = lidx[1:2, :]
    lu_oh_t = (lax.broadcasted_iota(jnp.int32, (nu, nlab), 0) == lu_row).astype(f32)  # (nu, nlab)
    lc_oh_t = (lax.broadcasted_iota(jnp.int32, (nc, nlab), 0) == lc_row).astype(f32)  # (nc, nlab)

    gram = lax.dot_general(xu2, xc2, dn, preferred_element_type=f32)        # (nu, nc) all-pairs dots
    sel_c = jnp.dot(gram, lc_oh_t, preferred_element_type=f32)              # (nu, nlab): gram[:, lc[l]]
    # out[l] = gram[lu[l], lc[l]]  -> select the lu[l] row per lane, sublane reduce.
    o_ref[...] = jnp.sum(lu_oh_t * sel_c, axis=0, keepdims=True)            # (1, nlab)


# ------------------------------ glue helpers ------------------------------- #

def _round_up(n, m):
    return ((n + m - 1) // m) * m


def prepare_params(params):
    """One-time parameter preparation, hoisted out of the per-call forward path."""
    f32 = jnp.float32
    nu = params["user_emb"].shape[0]
    nc = params["content_emb"].shape[0]
    nu_p = _round_up(nu, 8)
    nc_p = _round_up(nc, 8)

    # Fold the input-linear bias into the (full) embedding table.
    ube = jnp.pad((params["user_lin_b"] + params["user_emb"]).astype(f32),
                  ((0, nu_p - nu), (0, 0)))
    cbe = jnp.pad((params["content_lin_b"] + params["content_emb"]).astype(f32),
                  ((0, nc_p - nc), (0, 0)))

    def merged(layer, et):
        return jnp.concatenate(
            [params[f"{layer}_{et}_wlT"], params[f"{layer}_{et}_wrT"]], axis=0
        ).astype(f32)

    # Stack order must match kernel indices: 0=c1_rev, 1=c1_act, 2=c2_rev, 3=c2_act.
    w_stack = jnp.stack([merged("c1", "rev"), merged("c1", "act"),
                         merged("c2", "rev"), merged("c2", "act")])
    b_stack = jnp.stack([params["c1_rev_bl"], params["c1_act_bl"],
                         params["c2_rev_bl"], params["c2_act_bl"]]).astype(f32)

    return {
        "wu": params["user_lin_wT"].astype(f32),
        "wc": params["content_lin_wT"].astype(f32),
        "ube": ube,
        "cbe": cbe,
        "w_stack": w_stack,
        "b_stack": b_stack,
    }


@jax.jit
def model_forward(prepped, user_x, content_x, edge_index, edge_label_index):
    f32 = jnp.float32
    nu_p = prepped["ube"].shape[0]
    nc_p = prepped["cbe"].shape[0]
    num_edges = edge_index.shape[1]
    num_lab = edge_label_index.shape[1]
    e_p = _round_up(num_edges, 128)
    lab_p = _round_up(num_lab, 128)

    user_x_p = jnp.pad(user_x.astype(f32), ((0, nu_p - user_x.shape[0]), (0, 0)))
    content_x_p = jnp.pad(content_x.astype(f32), ((0, nc_p - content_x.shape[0]), (0, 0)))
    # Padded slots get index -1 so they never match a node id inside the kernel.
    eidx = jnp.pad(edge_index.astype(jnp.int32),
                   ((0, 0), (0, e_p - num_edges)), constant_values=-1)
    lidx = jnp.pad(edge_label_index.astype(jnp.int32),
                   ((0, 0), (0, lab_p - num_lab)), constant_values=-1)

    args = (
        user_x_p, content_x_p,
        prepped["wu"], prepped["wc"],
        prepped["ube"], prepped["cbe"],
        eidx, lidx,
        prepped["w_stack"], prepped["b_stack"],
    )

    out = pl.pallas_call(
        _fused_forward_kernel,
        out_shape=jax.ShapeDtypeStruct((1, lab_p), jnp.float32),
        in_specs=[pl.BlockSpec(memory_space=VMEM)] * len(args),
        out_specs=pl.BlockSpec(memory_space=VMEM),
    )(*args)

    return out[0, :num_lab]


def mean_adj(dst_idx, src_idx, n_dst, n_src):
    """Row-normalized adjacency A[dst, src] (PyG 'mean' aggregation)."""
    a = jnp.zeros((n_dst, n_src), jnp.float32).at[dst_idx, src_idx].add(1.0)
    deg = a.sum(axis=1, keepdims=True)
    return a / jnp.maximum(deg, 1.0)


def reference_forward(params, user_x, content_x, edge_index, edge_label_index):
    """Pure-JAX reference mirroring the same math."""
    nu, nc = user_x.shape[0], content_x.shape[0]
    xu = user_x @ params["user_lin_wT"] + params["user_lin_b"] + params["user_emb"]
    xc = content_x @ params["content_lin_wT"] + params["content_lin_b"] + params["content_emb"]
    A_cu = mean_adj(edge_index[1], edge_index[0], nc, nu)
    A_uc = mean_adj(edge_index[0], edge_index[1], nu, nc)

    def sage(A, xs, xd, wlT, bl, wrT, relu):
        o = (A @ xs) @ wlT + bl + xd @ wrT
        return jnp.maximum(o, 0.0) if relu else o

    xu1 = sage(A_uc, xc, xu, params["c1_rev_wlT"], params["c1_rev_bl"], params["c1_rev_wrT"], True)
    xc1 = sage(A_cu, xu, xc, params["c1_act_wlT"], params["c1_act_bl"], params["c1_act_wrT"], True)
    xu2 = sage(A_uc, xc1, xu1, params["c2_rev_wlT"], params["c2_rev_bl"], params["c2_rev_wrT"], False)
    xc2 = sage(A_cu, xu1, xc1, params["c2_act_wlT"], params["c2_act_bl"], params["c2_act_wrT"], False)
    return jnp.sum(xu2[edge_label_index[0]] * xc2[edge_label_index[1]], axis=-1)


# --------------------------------- main ------------------------------------ #

if __name__ == "__main__":
    H = 32
    NUM_USER_FEATURES = 8
    NUM_CONTENT_FEATURES = 12
    NUM_USERS = 16
    NUM_CONTENTS = 24
    NUM_EDGES = 40
    NUM_LABEL_EDGES = 12

    key = jax.random.PRNGKey(0)
    keys = jax.random.split(key, 24)
    ki = iter(keys)

    def rnd(shape, scale=0.1):
        return (scale * jax.random.normal(next(ki), shape)).astype(jnp.float32)

    params = {
        # Linear(in, H): weight [H, in] -> stored transposed [in, H]; bias [1, H]
        "user_lin_wT": rnd((NUM_USER_FEATURES, H)),
        "user_lin_b": rnd((1, H)),
        "content_lin_wT": rnd((NUM_CONTENT_FEATURES, H)),
        "content_lin_b": rnd((1, H)),
        # Embedding tables (Embedding(n, H) indexed by arange(n) -> full table)
        "user_emb": rnd((NUM_USERS, H)),
        "content_emb": rnd((NUM_CONTENTS, H)),
    }
    # to_hetero SAGEConv params: one SAGEConv per (edge type, layer)
    for layer in ("c1", "c2"):
        for et in ("act", "rev"):
            params[f"{layer}_{et}_wlT"] = rnd((H, H))   # lin_l weight^T
            params[f"{layer}_{et}_bl"] = rnd((1, H))    # lin_l bias
            params[f"{layer}_{et}_wrT"] = rnd((H, H))   # lin_r weight^T (no bias)

    # deterministic inputs (all indices are valid, i.e. < NUM_USERS / NUM_CONTENTS)
    user_x = rnd((NUM_USERS, NUM_USER_FEATURES), scale=1.0)
    content_x = rnd((NUM_CONTENTS, NUM_CONTENT_FEATURES), scale=1.0)
    edge_index = jnp.stack([
        jax.random.randint(next(ki), (NUM_EDGES,), 0, NUM_USERS),
        jax.random.randint(next(ki), (NUM_EDGES,), 0, NUM_CONTENTS),
    ]).astype(jnp.int32)
    edge_label_index = jnp.stack([
        jax.random.randint(next(ki), (NUM_LABEL_EDGES,), 0, NUM_USERS),
        jax.random.randint(next(ki), (NUM_LABEL_EDGES,), 0, NUM_CONTENTS),
    ]).astype(jnp.int32)

    prepped = prepare_params(params)   # one-time param prep, outside the jitted forward

    pred = model_forward(prepped, user_x, content_x, edge_index, edge_label_index)
    pred = jax.block_until_ready(pred)

    ref = reference_forward(params, user_x, content_x, edge_index, edge_label_index)
    assert pred.shape == (NUM_LABEL_EDGES,)
    assert jnp.allclose(pred, ref, atol=1e-4, rtol=1e-4), (pred, ref)

    print("KERNEL_OK")
</pallas_src>

<mosaic_0001>
module attributes {stable_mosaic.version = 11 : i64} {
  func.func @_fused_forward_kernel(%arg0: memref<16x8xf32, #tpu.memory_space<vmem>>, %arg1: memref<24x12xf32, #tpu.memory_space<vmem>>, %arg2: memref<8x32xf32, #tpu.memory_space<vmem>>, %arg3: memref<12x32xf32, #tpu.memory_space<vmem>>, %arg4: memref<16x32xf32, #tpu.memory_space<vmem>>, %arg5: memref<24x32xf32, #tpu.memory_space<vmem>>, %arg6: memref<2x128xi32, #tpu.memory_space<vmem>>, %arg7: memref<2x128xi32, #tpu.memory_space<vmem>>, %arg8: memref<4x64x32xf32, #tpu.memory_space<vmem>>, %arg9: memref<4x1x32xf32, #tpu.memory_space<vmem>>, %arg10: memref<1x128xf32, #tpu.memory_space<vmem>>) attributes {dimension_semantics = [], scalar_prefetch = 0 : i64, scratch_operands = 0 : i64, tpu.core_type = #tpu.core_type<tc>} {
    %c0 = arith.constant 0 : index
    %c0_0 = arith.constant 0 : index
    %0 = vector.load %arg6[%c0, %c0_0] : memref<2x128xi32, #tpu.memory_space<vmem>>, vector<2x128xi32>
    %1 = vector.extract_strided_slice %0 {offsets = [0, 0], sizes = [1, 128], strides = [1, 1]} : vector<2x128xi32> to vector<1x128xi32>
    %2 = vector.extract_strided_slice %0 {offsets = [1, 0], sizes = [1, 128], strides = [1, 1]} : vector<2x128xi32> to vector<1x128xi32>
    %3 = tpu.iota {dimensions = array<i32: 0>} : vector<16x128xi32>
    %4 = vector.broadcast %1 : vector<1x128xi32> to vector<16x128xi32>
    %5 = arith.cmpi eq, %3, %4 : vector<16x128xi32>
    %6 = arith.extui %5 : vector<16x128xi1> to vector<16x128xi32>
    %7 = arith.sitofp %6 : vector<16x128xi32> to vector<16x128xf32>
    %8 = tpu.iota {dimensions = array<i32: 0>} : vector<24x128xi32>
    %9 = vector.broadcast %2 : vector<1x128xi32> to vector<24x128xi32>
    %10 = arith.cmpi eq, %8, %9 : vector<24x128xi32>
    %11 = arith.extui %10 : vector<24x128xi1> to vector<24x128xi32>
    %12 = arith.sitofp %11 : vector<24x128xi32> to vector<24x128xf32>
    %cst = arith.constant dense<0.000000e+00> : vector<16x24xf32>
    %13 = tpu.matmul %7, %12, %cst {dimension_numbers = #tpu.dot_dimension_numbers<[1], [1], [0], [0], [0, 0, 1, 0], [], []>} : vector<16x128xf32>, vector<24x128xf32>, vector<16x24xf32> -> vector<16x24xf32>
    %cst_1 = arith.constant dense<0.000000e+00> : vector<24x16xf32>
    %14 = tpu.matmul %12, %7, %cst_1 {dimension_numbers = #tpu.dot_dimension_numbers<[1], [1], [0], [0], [0, 0, 1, 0], [], []>} : vector<24x128xf32>, vector<16x128xf32>, vector<24x16xf32> -> vector<24x16xf32>
    %cst_2 = arith.constant dense<0.000000e+00> : vector<16xf32>
    %15 = vector.multi_reduction <add>, %13, %cst_2 [1] : vector<16x24xf32> to vector<16xf32>
    %16 = vector.shape_cast %15 : vector<16xf32> to vector<16x1xf32>
    %cst_3 = arith.constant 1.000000e+00 : f32
    %17 = vector.broadcast %cst_3 : f32 to vector<16x1xf32>
    %18 = arith.maximumf %16, %17 : vector<16x1xf32>
    %19 = vector.broadcast %18 : vector<16x1xf32> to vector<16x24xf32>
    %20 = arith.divf %13, %19 : vector<16x24xf32>
    %cst_4 = arith.constant dense<0.000000e+00> : vector<24xf32>
    %21 = vector.multi_reduction <add>, %14, %cst_4 [1] : vector<24x16xf32> to vector<24xf32>
    %22 = vector.shape_cast %21 : vector<24xf32> to vector<24x1xf32>
    %cst_5 = arith.constant 1.000000e+00 : f32
    %23 = vector.broadcast %cst_5 : f32 to vector<24x1xf32>
    %24 = arith.maximumf %22, %23 : vector<24x1xf32>
    %25 = vector.broadcast %24 : vector<24x1xf32> to vector<24x16xf32>
    %26 = arith.divf %14, %25 : vector<24x16xf32>
    %c0_6 = arith.constant 0 : index
    %c0_7 = arith.constant 0 : index
    %27 = vector.load %arg0[%c0_6, %c0_7] : memref<16x8xf32, #tpu.memory_space<vmem>>, vector<16x8xf32>
    %c0_8 = arith.constant 0 : index
    %c0_9 = arith.constant 0 : index
    %28 = vector.load %arg2[%c0_8, %c0_9] : memref<8x32xf32, #tpu.memory_space<vmem>>, vector<8x32xf32>
    %cst_10 = arith.constant dense<0.000000e+00> : vector<16x32xf32>
    %29 = tpu.matmul %27, %28, %cst_10 {dimension_numbers = #tpu.dot_dimension_numbers<[1], [0], [0], [1], [0, 0, 1, 1], [], []>} : vector<16x8xf32>, vector<8x32xf32>, vector<16x32xf32> -> vector<16x32xf32>
    %c0_11 = arith.constant 0 : index
    %c0_12 = arith.constant 0 : index
    %30 = vector.load %arg4[%c0_11, %c0_12] : memref<16x32xf32, #tpu.memory_space<vmem>>, vector<16x32xf32>
    %31 = arith.addf %29, %30 : vector<16x32xf32>
    %c0_13 = arith.constant 0 : index
    %c0_14 = arith.constant 0 : index
    %32 = vector.load %arg1[%c0_13, %c0_14] : memref<24x12xf32, #tpu.memory_space<vmem>>, vector<24x12xf32>
    %c0_15 = arith.constant 0 : index
    %c0_16 = arith.constant 0 : index
    %33 = vector.load %arg3[%c0_15, %c0_16] : memref<12x32xf32, #tpu.memory_space<vmem>>, vector<12x32xf32>
    %cst_17 = arith.constant dense<0.000000e+00> : vector<24x32xf32>
    %34 = tpu.matmul %32, %33, %cst_17 {dimension_numbers = #tpu.dot_dimension_numbers<[1], [0], [0], [1], [0, 0, 1, 1], [], []>} : vector<24x12xf32>, vector<12x32xf32>, vector<24x32xf32> -> vector<24x32xf32>
    %c0_18 = arith.constant 0 : index
    %c0_19 = arith.constant 0 : index
    %35 = vector.load %arg5[%c0_18, %c0_19] : memref<24x32xf32, #tpu.memory_space<vmem>>, vector<24x32xf32>
    %36 = arith.addf %34, %35 : vector<24x32xf32>
    %c0_20 = arith.constant 0 : index
    %c0_21 = arith.constant 0 : index
    %c0_22 = arith.constant 0 : index
    %37 = vector.load %arg8[%c0_20, %c0_21, %c0_22] : memref<4x64x32xf32, #tpu.memory_space<vmem>>, vector<1x64x32xf32>
    %38 = vector.shape_cast %37 : vector<1x64x32xf32> to vector<64x32xf32>
    %cst_23 = arith.constant dense<0.000000e+00> : vector<16x32xf32>
    %39 = tpu.matmul %20, %36, %cst_23 {dimension_numbers = #tpu.dot_dimension_numbers<[1], [0], [0], [1], [0, 0, 1, 1], [], []>} : vector<16x24xf32>, vector<24x32xf32>, vector<16x32xf32> -> vector<16x32xf32>
    %40 = vector.extract_strided_slice %38 {offsets = [0, 0], sizes = [32, 32], strides = [1, 1]} : vector<64x32xf32> to vector<32x32xf32>
    %cst_24 = arith.constant dense<0.000000e+00> : vector<16x32xf32>
    %41 = tpu.matmul %39, %40, %cst_24 {dimension_numbers = #tpu.dot_dimension_numbers<[1], [0], [0], [1], [0, 0, 1, 1], [], []>} : vector<16x32xf32>, vector<32x32xf32>, vector<16x32xf32> -> vector<16x32xf32>
    %42 = vector.extract_strided_slice %38 {offsets = [32, 0], sizes = [32, 32], strides = [1, 1]} : vector<64x32xf32> to vector<32x32xf32>
    %cst_25 = arith.constant dense<0.000000e+00> : vector<16x32xf32>
    %43 = tpu.matmul %31, %42, %cst_25 {dimension_numbers = #tpu.dot_dimension_numbers<[1], [0], [0], [1], [0, 0, 1, 1], [], []>} : vector<16x32xf32>, vector<32x32xf32>, vector<16x32xf32> -> vector<16x32xf32>
    %44 = arith.addf %41, %43 : vector<16x32xf32>
    %c0_26 = arith.constant 0 : index
    %c0_27 = arith.constant 0 : index
    %c0_28 = arith.constant 0 : index
    %45 = vector.load %arg9[%c0_26, %c0_27, %c0_28] : memref<4x1x32xf32, #tpu.memory_space<vmem>>, vector<1x1x32xf32>
    %46 = vector.shape_cast %45 : vector<1x1x32xf32> to vector<1x32xf32>
    %47 = vector.broadcast %46 : vector<1x32xf32> to vector<16x32xf32>
    %48 = arith.addf %44, %47 : vector<16x32xf32>
    %cst_29 = arith.constant 0.000000e+00 : f32
    %49 = vector.broadcast %cst_29 : f32 to vector<16x32xf32>
    %50 = arith.maximumf %48, %49 : vector<16x32xf32>
    %c1 = arith.constant 1 : index
    %c0_30 = arith.constant 0 : index
    %c0_31 = arith.constant 0 : index
    %51 = vector.load %arg8[%c1, %c0_30, %c0_31] : memref<4x64x32xf32, #tpu.memory_space<vmem>>, vector<1x64x32xf32>
    %52 = vector.shape_cast %51 : vector<1x64x32xf32> to vector<64x32xf32>
    %cst_32 = arith.constant dense<0.000000e+00> : vector<24x32xf32>
    %53 = tpu.matmul %26, %31, %cst_32 {dimension_numbers = #tpu.dot_dimension_numbers<[1], [0], [0], [1], [0, 0, 1, 1], [], []>} : vector<24x16xf32>, vector<16x32xf32>, vector<24x32xf32> -> vector<24x32xf32>
    %54 = vector.extract_strided_slice %52 {offsets = [0, 0], sizes = [32, 32], strides = [1, 1]} : vector<64x32xf32> to vector<32x32xf32>
    %cst_33 = arith.constant dense<0.000000e+00> : vector<24x32xf32>
    %55 = tpu.matmul %53, %54, %cst_33 {dimension_numbers = #tpu.dot_dimension_numbers<[1], [0], [0], [1], [0, 0, 1, 1], [], []>} : vector<24x32xf32>, vector<32x32xf32>, vector<24x32xf32> -> vector<24x32xf32>
    %56 = vector.extract_strided_slice %52 {offsets = [32, 0], sizes = [32, 32], strides = [1, 1]} : vector<64x32xf32> to vector<32x32xf32>
    %cst_34 = arith.constant dense<0.000000e+00> : vector<24x32xf32>
    %57 = tpu.matmul %36, %56, %cst_34 {dimension_numbers = #tpu.dot_dimension_numbers<[1], [0], [0], [1], [0, 0, 1, 1], [], []>} : vector<24x32xf32>, vector<32x32xf32>, vector<24x32xf32> -> vector<24x32xf32>
    %58 = arith.addf %55, %57 : vector<24x32xf32>
    %c1_35 = arith.constant 1 : index
    %c0_36 = arith.constant 0 : index
    %c0_37 = arith.constant 0 : index
    %59 = vector.load %arg9[%c1_35, %c0_36, %c0_37] : memref<4x1x32xf32, #tpu.memory_space<vmem>>, vector<1x1x32xf32>
    %60 = vector.shape_cast %59 : vector<1x1x32xf32> to vector<1x32xf32>
    %61 = vector.broadcast %60 : vector<1x32xf32> to vector<24x32xf32>
    %62 = arith.addf %58, %61 : vector<24x32xf32>
    %cst_38 = arith.constant 0.000000e+00 : f32
    %63 = vector.broadcast %cst_38 : f32 to vector<24x32xf32>
    %64 = arith.maximumf %62, %63 : vector<24x32xf32>
    %c2 = arith.constant 2 : index
    %c0_39 = arith.constant 0 : index
    %c0_40 = arith.constant 0 : index
    %65 = vector.load %arg8[%c2, %c0_39, %c0_40] : memref<4x64x32xf32, #tpu.memory_space<vmem>>, vector<1x64x32xf32>
    %66 = vector.shape_cast %65 : vector<1x64x32xf32> to vector<64x32xf32>
    %cst_41 = arith.constant dense<0.000000e+00> : vector<16x32xf32>
    %67 = tpu.matmul %20, %64, %cst_41 {dimension_numbers = #tpu.dot_dimension_numbers<[1], [0], [0], [1], [0, 0, 1, 1], [], []>} : vector<16x24xf32>, vector<24x32xf32>, vector<16x32xf32> -> vector<16x32xf32>
    %68 = vector.extract_strided_slice %66 {offsets = [0, 0], sizes = [32, 32], strides = [1, 1]} : vector<64x32xf32> to vector<32x32xf32>
    %cst_42 = arith.constant dense<0.000000e+00> : vector<16x32xf32>
    %69 = tpu.matmul %67, %68, %cst_42 {dimension_numbers = #tpu.dot_dimension_numbers<[1], [0], [0], [1], [0, 0, 1, 1], [], []>} : vector<16x32xf32>, vector<32x32xf32>, vector<16x32xf32> -> vector<16x32xf32>
    %70 = vector.extract_strided_slice %66 {offsets = [32, 0], sizes = [32, 32], strides = [1, 1]} : vector<64x32xf32> to vector<32x32xf32>
    %cst_43 = arith.constant dense<0.000000e+00> : vector<16x32xf32>
    %71 = tpu.matmul %50, %70, %cst_43 {dimension_numbers = #tpu.dot_dimension_numbers<[1], [0], [0], [1], [0, 0, 1, 1], [], []>} : vector<16x32xf32>, vector<32x32xf32>, vector<16x32xf32> -> vector<16x32xf32>
    %72 = arith.addf %69, %71 : vector<16x32xf32>
    %c2_44 = arith.constant 2 : index
    %c0_45 = arith.constant 0 : index
    %c0_46 = arith.constant 0 : index
    %73 = vector.load %arg9[%c2_44, %c0_45, %c0_46] : memref<4x1x32xf32, #tpu.memory_space<vmem>>, vector<1x1x32xf32>
    %74 = vector.shape_cast %73 : vector<1x1x32xf32> to vector<1x32xf32>
    %75 = vector.broadcast %74 : vector<1x32xf32> to vector<16x32xf32>
    %76 = arith.addf %72, %75 : vector<16x32xf32>
    %c3 = arith.constant 3 : index
    %c0_47 = arith.constant 0 : index
    %c0_48 = arith.constant 0 : index
    %77 = vector.load %arg8[%c3, %c0_47, %c0_48] : memref<4x64x32xf32, #tpu.memory_space<vmem>>, vector<1x64x32xf32>
    %78 = vector.shape_cast %77 : vector<1x64x32xf32> to vector<64x32xf32>
    %cst_49 = arith.constant dense<0.000000e+00> : vector<24x32xf32>
    %79 = tpu.matmul %26, %50, %cst_49 {dimension_numbers = #tpu.dot_dimension_numbers<[1], [0], [0], [1], [0, 0, 1, 1], [], []>} : vector<24x16xf32>, vector<16x32xf32>, vector<24x32xf32> -> vector<24x32xf32>
    %80 = vector.extract_strided_slice %78 {offsets = [0, 0], sizes = [32, 32], strides = [1, 1]} : vector<64x32xf32> to vector<32x32xf32>
    %cst_50 = arith.constant dense<0.000000e+00> : vector<24x32xf32>
    %81 = tpu.matmul %79, %80, %cst_50 {dimension_numbers = #tpu.dot_dimension_numbers<[1], [0], [0], [1], [0, 0, 1, 1], [], []>} : vector<24x32xf32>, vector<32x32xf32>, vector<24x32xf32> -> vector<24x32xf32>
    %82 = vector.extract_strided_slice %78 {offsets = [32, 0], sizes = [32, 32], strides = [1, 1]} : vector<64x32xf32> to vector<32x32xf32>
    %cst_51 = arith.constant dense<0.000000e+00> : vector<24x32xf32>
    %83 = tpu.matmul %64, %82, %cst_51 {dimension_numbers = #tpu.dot_dimension_numbers<[1], [0], [0], [1], [0, 0, 1, 1], [], []>} : vector<24x32xf32>, vector<32x32xf32>, vector<24x32xf32> -> vector<24x32xf32>
    %84 = arith.addf %81, %83 : vector<24x32xf32>
    %c3_52 = arith.constant 3 : index
    %c0_53 = arith.constant 0 : index
    %c0_54 = arith.constant 0 : index
    %85 = vector.load %arg9[%c3_52, %c0_53, %c0_54] : memref<4x1x32xf32, #tpu.memory_space<vmem>>, vector<1x1x32xf32>
    %86 = vector.shape_cast %85 : vector<1x1x32xf32> to vector<1x32xf32>
    %87 = vector.broadcast %86 : vector<1x32xf32> to vector<24x32xf32>
    %88 = arith.addf %84, %87 : vector<24x32xf32>
    %c0_55 = arith.constant 0 : index
    %c0_56 = arith.constant 0 : index
    %89 = vector.load %arg7[%c0_55, %c0_56] : memref<2x128xi32, #tpu.memory_space<vmem>>, vector<2x128xi32>
    %90 = vector.extract_strided_slice %89 {offsets = [0, 0], sizes = [1, 128], strides = [1, 1]} : vector<2x128xi32> to vector<1x128xi32>
    %91 = vector.extract_strided_slice %89 {offsets = [1, 0], sizes = [1, 128], strides = [1, 1]} : vector<2x128xi32> to vector<1x128xi32>
    %92 = tpu.iota {dimensions = array<i32: 0>} : vector<16x128xi32>
    %93 = vector.broadcast %90 : vector<1x128xi32> to vector<16x128xi32>
    %94 = arith.cmpi eq, %92, %93 : vector<16x128xi32>
    %95 = arith.extui %94 : vector<16x128xi1> to vector<16x128xi32>
    %96 = arith.sitofp %95 : vector<16x128xi32> to vector<16x128xf32>
    %97 = tpu.iota {dimensions = array<i32: 0>} : vector<24x128xi32>
    %98 = vector.broadcast %91 : vector<1x128xi32> to vector<24x128xi32>
    %99 = arith.cmpi eq, %97, %98 : vector<24x128xi32>
    %100 = arith.extui %99 : vector<24x128xi1> to vector<24x128xi32>
    %101 = arith.sitofp %100 : vector<24x128xi32> to vector<24x128xf32>
    %cst_57 = arith.constant dense<0.000000e+00> : vector<16x24xf32>
    %102 = tpu.matmul %76, %88, %cst_57 {dimension_numbers = #tpu.dot_dimension_numbers<[1], [1], [0], [0], [0, 0, 1, 0], [], []>} : vector<16x32xf32>, vector<24x32xf32>, vector<16x24xf32> -> vector<16x24xf32>
    %cst_58 = arith.constant dense<0.000000e+00> : vector<16x128xf32>
    %103 = tpu.matmul %102, %101, %cst_58 {dimension_numbers = #tpu.dot_dimension_numbers<[1], [0], [0], [1], [0, 0, 1, 1], [], []>} : vector<16x24xf32>, vector<24x128xf32>, vector<16x128xf32> -> vector<16x128xf32>
    %104 = arith.mulf %96, %103 : vector<16x128xf32>
    %cst_59 = arith.constant dense<0.000000e+00> : vector<128xf32>
    %105 = vector.multi_reduction <add>, %104, %cst_59 [0] : vector<16x128xf32> to vector<128xf32>
    %106 = vector.shape_cast %105 : vector<128xf32> to vector<1x128xf32>
    %c0_60 = arith.constant 0 : index
    %c0_61 = arith.constant 0 : index
    %107 = vector.load %arg10[%c0_60, %c0_61] : memref<1x128xf32, #tpu.memory_space<vmem>>, vector<1x128xf32>
    tpu.vector_store %arg10[%c0_60, %c0_61], %106 {strides = array<i32>} : memref<1x128xf32, #tpu.memory_space<vmem>>, vector<1x128xf32>,
    return
  }
}

</mosaic_0001>

<bundles_post_ra>
// kernel: model_forward.1
= control target key start
LH: loop header
LB: loop body
LE: loop exit
PB: predicated region body
PF: predicated region fallthrough
CT: control target
= control target key end

     0   :  { %v36_v0 = vlaneseq  ;;  %v2257_v1 = vmov 0.0|0.0   ;;  %vm2258_vm0 = vmmov 0   ;;  %v2259_v3 = vmov 0.0   ;;  %s2696_s6 = inlined_call_operand.vmem [shape: s32[2,128], index: 6, kind: input, shape index: {}]   ;;  %s2697_s2 = inlined_call_operand.vmem [shape: f32[8,32], index: 2, kind: input, shape index: {}]   ;;  %s2698_s3 = inlined_call_operand.vmem [shape: f32[12,32], index: 3, kind: input, shape index: {}]   ;;  %s2699_s0 = inlined_call_operand.vmem [shape: f32[16,8], index: 0, kind: input, shape index: {}]   ;;  %s2700_s1 = inlined_call_operand.vmem [shape: f32[24,12], index: 1, kind: input, shape index: {}]   ;;  %s2701_s4 = inlined_call_operand.vmem [shape: f32[16,32], index: 4, kind: input, shape index: {}]   ;;  %s2702_s5 = inlined_call_operand.vmem [shape: f32[24,32], index: 5, kind: input, shape index: {}]   ;;  %s2703_s8 = inlined_call_operand.vmem [shape: f32[4,64,32], index: 8, kind: input, shape index: {}]   ;;  %s2704_s9 = inlined_call_operand.vmem [shape: f32[4,1,32], index: 9, kind: input, shape index: {}]   ;;  %s2705_s7 = inlined_call_operand.vmem [shape: s32[2,128], index: 7, kind: input, shape index: {}]   ;;  %s2706_s10 = inlined_call_operand.vmem [shape: f32[1,128], index: 10, kind: output, shape index: {}]  }
   0x1   :  { %2150 = vmatprep.subr.bf16.mxu1 %v2257_v1  ;;  %1945 = vmatprep.mubr.msk.f32.mxu1 %vm2258_vm0, %v2259_v3  ;;  %v35_v4 = vld [vmem:[%s2696_s6] sm:$0x3]  ;;  %v2260_v11 = vmov 1.0   ;;  %v2261_v12 = vmov 1.0|1.0   ;;  %vm255_vm8 = vcmask 64512  }
   0x2   :  { %v2319_v2 = vshrl.u32 %v36_v0, 7  ;;  %v252_v13 = vld [vmem:[%s2697_s2] sm:$0xff]  ;;  %v341_v15 = vld [vmem:[%s2698_s3 + $0x8] sm:$0xf]  ;;  %vm355_vm9 = vcmask 1043456   ;;  %vm2262_vm10 = vmmov 1  }
   0x3   :  { %v340_v14 = vld [vmem:[%s2698_s3] sm:$0xff]  ;;  %v251_v17 = vld [vmem:[%s2699_s0 + $0x8] sm:$0xff]  ;;  %vm2155_vm11 = vmpackc.low %vm355_vm9, %vm2262_vm10  ;;  %vm345_vm12 = vcmask 97280   ;;  %vm231_vm13 = vcmask 130048   ;;  %vm218_vm14 = vcmask 195584   ;;  %vm528_vm15 = vcmask 261120  }
   0x4   :  { %v2327_v5 = vadd.s32 8, %v2319_v2  ;;  %v52_v6 = vsub.s32 1, %v2319_v2  ;;  %v41_v7 = vsub.s32 0, %v2319_v2  ;;  %v2332_v8 = vadd.s32 16, %v2319_v2  ;;  %v250_v16 = vld [vmem:[%s2699_s0] sm:$0xff]  ;;  %v338_v20 = vld [vmem:[%s2700_s1 + $0x8] sm:$0xff] }
   0x5   :  { %v2154_v18 = vpack.c.bf16 %v341_v15, %v340_v14  ;;  %v337_v19 = vld [vmem:[%s2700_s1] sm:$0xff]  ;;  %v339_v21 = vld [vmem:[%s2700_s1 + $0x10] sm:$0xff]  ;;  %v254_v36 = vld [vmem:[%s2701_s4 + $0x8] sm:$0xff] }
   0x6   :  { %v53_v9 = vrot.slane %v35_v4, %v52_v6  ;;  %v42_v10 = vrot.slane %v35_v4, %v41_v7  ;;  %v253_v38 = vld [vmem:[%s2701_s4] sm:$0xff]  ;;  %v343_v45 = vld [vmem:[%s2702_s5 + $0x8] sm:$0xff]  ;;  %v344_v51 = vld [vmem:[%s2702_s5 + $0x10] sm:$0xff] }
   0x7   :  { %v342_v44 = vld [vmem:[%s2702_s5] sm:$0xff]  ;;  %v444_v56 = vld [vmem:[%s2703_s8 + $0x28] sm:$0xff] }
   0x8   :  { %vm54_vm1 = vcmp.eq.s32.totalorder %v2319_v2, %v53_v9  ;;  %vm55_vm2 = vcmp.eq.s32.totalorder %v2327_v5, %v53_v9  ;;  %vm43_vm3 = vcmp.eq.s32.totalorder %v2319_v2, %v42_v10  ;;  %vm44_vm4 = vcmp.eq.s32.totalorder %v2327_v5, %v42_v10  ;;  %v443_v55 = vld [vmem:[%s2703_s8 + $0x20] sm:$0xff]  ;;  %v1768_v10 = vld [vmem:[%s2703_s8 + $0x68] sm:$0xff] }
   0x9   :  { %vm2146_vm5 = vmpackc.low %vm55_vm2, %vm54_vm1  ;;  %vm56_vm6 = vcmp.eq.s32.totalorder %v2332_v8, %v53_v9  ;;  %1938 = vmatprep.mubr.msk.f32.mxu0 %vm43_vm3, %v2260_v11  ;;  %v2161_v57 = vpack.c.bf16 %v444_v56, %v443_v55  ;;  %v1767_v9 = vld [vmem:[%s2703_s8 + $0x60] sm:$0xff] }
   0xa   :  { %2147 = vmatprep.subr.msk.bf16.mxu0 %vm2146_vm5, %v2261_v12  ;;  %vm2151_vm7 = vmpackc.low %vm44_vm4, %vm43_vm3  ;;  %v2181_v15 = vpack.c.bf16 %v1768_v10, %v1767_v9  ;;  %v1762_v10 = vld [vmem:[%s2704_s9] ss:$0 sm:$0xff] }
   0xb   :  { %2152 = vmatpush3.bf16.xpose.msk.msra.mxu1 %vm2151_vm7, %v2261_v12  ;;  %2149 = vmatpush3.bf16.xpose.msk.msra.mxu0 %vm2146_vm5, %v2261_v12 }
   0xc   :  { %1936 = vmatprep.subr.msk.mxu0 %vm56_vm6, %v2260_v11 }
  0x12   :  { %1946 = vmatmul.mubr.msk.f32.vlgmr.msra.gmra.mrb[0].mxu1 %vm54_vm1, %v2260_v11 }
  0x13   :  { %1937 = vmatpush3.xpose.msk.msra.mxu0 %vm56_vm6, %v2260_v11  ;;  %1948 = vmatprep.mubr.msk.f32.mxu1 %vm2258_vm0, %v2259_v3 }
  0x14   :  { %1954 = vmatprep.subr.mxu0 %v252_v13 }
  0x16   :  { %1949 = vmatmul.mubr.msk.f32.gmra.mrb[2].mxu1 %vm55_vm2, %v2260_v11  ;;  %1939 = vmatmul.mubr.msk.f32.vlgmr.msra.gmra.mrb[0].mxu0 %vm44_vm4, %v2260_v11 }
  0x17   :  { %1951 = vmatprep.mubr.msk.f32.mxu1 %vm2258_vm0, %v2259_v3  ;;  %1955 = vmatpush3.msra.mxu0 %v252_v13 }
  0x18   :  { %1956 = vmatprep.mubr.msk.f32.mxu0 %vm255_vm8, %v250_v16  ;;  %2153 = vmatprep.subr.bf16.mxu0 %v2257_v1 }
  0x1a   :  { %1952 = vmatmul.mubr.msk.f32.gmra.mrb[4].mxu1 %vm56_vm6, %v2260_v11  ;;  %1957 = vmatmul.mubr.msk.f32.vlgmr.msra.gmra.mrb[2].mxu0 %vm255_vm8, %v251_v17 }
  0x1b   :  { %2156 = vmatpush3.bf16.msk.msra.mxu0 %vm2155_vm11, %v2154_v18  ;;  %1963 = vmatprep.mubr.msk.f32.mxu0 %vm2258_vm0, %v2259_v3  ;;  %v1769_v18 = vld [vmem:[%s2703_s8 + $0x70] sm:$0xff] }
  0x1c   :  { %2177 = vmatprep.subr.bf16.mxu0 %v2257_v1 }
  0x1e   :  { %1964 = vmatmul.mubr.msk.f32.vlgmr.msra.gmra.mrb[4].mxu0 %vm345_vm12, %v337_v19  ;;  %v1770_v19 = vld [vmem:[%s2703_s8 + $0x78] sm:$0xff] }
  0x1f   :  { %1966 = vmatprep.mubr.msk.f32.mxu0 %vm2258_vm0, %v2259_v3 }
  0x22   :  { %1967 = vmatmul.mubr.msk.f32.gmra.mrb[6].mxu0 %vm345_vm12, %v338_v20 }
  0x23   :  { %1969 = vmatprep.mubr.msk.f32.mxu0 %vm2258_vm0, %v2259_v3 }
  0x26   :  { %1970 = vmatmul.mubr.msk.f32.gmra.mrb[8].mxu0 %vm345_vm12, %v339_v21 }
  0x27   :  { %2007 = vmatprep.mubr.msk.f32.mxu0 %vm2258_vm0, %v2259_v3 }
  0xe5   :  { %v2409_v22 = vpop.f32.mrb[0].mxu1 }
  0xe6   :  { %v232_v23 = vsel %vm231_vm13, %v2409_v22, 0.0  ;;  %v1947_v24 = vpop.f32.mrb[1].mxu1 }
  0xe7   :  { %233 = vadd.xlane.f32.xlu1 %v232_v23  ;;  %v2184_v23 = vpack.c.bf16 %v1770_v19, %v1769_v18  ;;  %v1784_v18 = vld [vmem:[%s2703_s8 + $0x90] sm:$0xff]  ;;  %v1785_v19 = vld [vmem:[%s2703_s8 + $0x98] sm:$0xff] }
  0xe9   :  { %v2413_v25 = vpop.f32.mrb[2].mxu1  ;;  %v2415_v26 = vpop.f32.mrb[0].mxu0 }
  0xea   :  { %v235_v27 = vsel %vm231_vm13, %v2413_v25, 0.0  ;;  %v2419_v28 = vpop.f32.mrb[1].mxu0  ;;  %v1950_v29 = vpop.f32.mrb[3].mxu1  ;;  %v222_v33 = vsel %vm218_vm14, %v2415_v26, 0.0 }
  0xeb   :  { %236 = vadd.xlane.f32.xlu1 %v235_v27  ;;  %v219_v30 = vsel %vm218_vm14, %v2419_v28, 0.0  ;;  %v445_v27 = vld [vmem:[%s2703_s8 + $0x30] sm:$0xff]  ;;  %v446_v29 = vld [vmem:[%s2703_s8 + $0x38] sm:$0xff] }
  0xec   :  { %220 = vadd.xlane.f32.xlu0 %v219_v30  ;;  %v2165_v30 = vpack.c.bf16 %v446_v29, %v445_v27 }
  0xed   :  { %v2423_v31 = vpop.f32.mrb[4].mxu1  ;;  %v1958_v35 = vpop.f32.mrb[2].mxu0 }
  0xee   :  { %v1953_v32 = vpop.f32.mrb[5].mxu1  ;;  %v238_v34 = vsel %vm231_vm13, %v2423_v31, 0.0  ;;  %v328_v37 = vpop.f32.mrb[3].mxu0  ;;  %v2435_v39 = vadd.f32 %v1958_v35, %v254_v36  ;;  %v441_v35 = vld [vmem:[%s2703_s8 + $0x10] sm:$0xff]  ;;  %v442_v36 = vld [vmem:[%s2703_s8 + $0x18] sm:$0xff] }
  0xef   :  { %v2437_v40 = vadd.f32 %v328_v37, %v253_v38  ;;  %v2173_v37 = vpack.c.bf16 %v442_v36, %v441_v35 }
  0xf0   :  { %223 = vadd.xlane.f32.xlu0 %v222_v33 }
  0xf1   :  { %v425_v41 = vpop.f32.mrb[4].mxu0  ;;  %v2178_v43 = vpack.c.bf16 %v2435_v39, %v2437_v40 }
  0xf2   :  { %v1965_v42 = vpop.f32.mrb[5].mxu0  ;;  %v2447_v47 = vadd.f32 %v425_v41, %v342_v44 }
  0xf3   :  { %2179 = vmatpush3.bf16.msra.mxu0 %v2178_v43  ;;  %v1763_v42 = vld [vmem:[%s2703_s8 + $0x40] sm:$0xff]  ;;  %v1764_v43 = vld [vmem:[%s2703_s8 + $0x48] sm:$0xff] }
  0xf4   :  { %239 = vadd.xlane.f32.xlu0 %v238_v34  ;;  %2180 = vmatprep.subr.bf16.mxu0 %v2257_v1 }
  0xf5   :  { %v430_v46 = vpop.f32.mrb[6].mxu0 }
  0xf6   :  { %v2449_v48 = vadd.f32 %v430_v46, %v343_v45  ;;  %v1968_v49 = vpop.f32.mrb[7].mxu0  ;;  %v2187_v45 = vpack.c.bf16 %v1764_v43, %v1763_v42 }
  0xf7   :  { %v1786_v49 = vld [vmem:[%s2703_s8 + $0xa0] sm:$0xff] }
  0xf8   :  { %v2157_v50 = vpack.c.bf16 %v2449_v48, %v2447_v47 }
  0xf9   :  { %v435_v52 = vpop.f32.mrb[8].mxu0 }
  0xfa   :  { %2158 = vmatprep.subr.bf16.mxu1 %v2157_v50  ;;  %v2457_v53 = vadd.f32 %v435_v52, %v344_v51  ;;  %v1971_v54 = vpop.f32.mrb[9].mxu0 }
  0xfb   :  { %2160 = vmatpush3.bf16.msra.mxu1 %v2157_v50  ;;  %v1787_v50 = vld [vmem:[%s2703_s8 + $0xa8] sm:$0xff] }
  0xfc   :  { %1976 = vmatprep.subr.mxu1 %v2457_v53  ;;  %v2196_v54 = vpack.c.bf16 %v1787_v50, %v1786_v49 }
  0xff   :  { %1977 = vmatpush3.msra.mxu1 %v2457_v53 }
 0x100   :  { %2162 = vmatprep.subr.bf16.mxu1 %v2161_v57 }
 0x174   :  { %v234_v58 = vpop.xlane.xlu1 %233 }
 0x175   :  { %v241_v59 = vmax.f32 %v234_v58, 1.0 }
 0x177   :  { %2247 = vrcp.f32 %v241_v59 }
 0x178   :  { %v237_v60 = vpop.xlane.xlu1 %236 }
 0x179   :  { %v242_v61 = vmax.f32 %v237_v60, 1.0  ;;  %v221_v62 = vpop.xlane.xlu0 %220 }
 0x17a   :  { %v225_v63 = vmax.f32 %v221_v62, 1.0  ;;  %v1789_v62 = vld [vmem:[%s2703_s8 + $0xb8] sm:$0xff] }
 0x17b   :  { %2249 = vrcp.f32 %v242_v61  ;;  %v1788_v61 = vld [vmem:[%s2703_s8 + $0xb0] sm:$0xff] }
 0x17c   :  { %2251 = vrcp.f32 %v225_v63  ;;  %v2200_v63 = vpack.c.bf16 %v1789_v62, %v1788_v61 }
 0x17d   :  { %v224_v0 = vpop.xlane.xlu0 %223 }
 0x17e   :  { %v226_v4 = vmax.f32 %v224_v0, 1.0  ;;  %v1782_v0 = vld [vmem:[%s2703_s8 + $0x80] sm:$0xff] }
 0x180   :  { %2253 = vrcp.f32 %v226_v4  ;;  %v1783_v4 = vld [vmem:[%s2703_s8 + $0x88] sm:$0xff] }
 0x181   :  { %v2248_v13 = vpop.eup %2247  ;;  %v240_v14 = vpop.xlane.xlu0 %239  ;;  %v2204_v9 = vpack.c.bf16 %v1783_v4, %v1782_v0  ;;  %v1526_v4 = vld [vmem:[%s2705_s7] sm:$0x3] }
 0x182   :  { %v2474_v16 = vmul.f32 %v2248_v13, %v2409_v22  ;;  %v243_v17 = vmax.f32 %v240_v14, 1.0 }
 0x184   :  { %2255 = vrcp.f32 %v243_v17  ;;  %2008 = vmatmul.mubr.msk.f32.vlgmr.msra.gmra.mrb[10].mxu0 %vm231_vm13, %v2474_v16 }
 0x185   :  { %v2250_v20 = vpop.eup %2249  ;;  %2010 = vmatprep.mubr.msk.f32.mxu0 %vm2258_vm0, %v2259_v3  ;;  %2182 = vmatpush3.bf16.msra.mxu0 %v2181_v15 }
 0x186   :  { %v2252_v21 = vpop.eup %2251  ;;  %v2487_v22 = vmul.f32 %v2250_v20, %v2413_v25  ;;  %2183 = vmatprep.subr.bf16.mxu0 %v2257_v1 }
 0x187   :  { %v228_v24 = vmul.f32 %v2252_v21, %v2419_v28 }
 0x188   :  { %2011 = vmatmul.mubr.msk.f32.gmra.mrb[12].mxu0 %vm231_vm13, %v2487_v22 }
 0x189   :  { %1978 = vmatprep.mubr.msk.f32.mxu1 %vm218_vm14, %v228_v24  ;;  %2013 = vmatprep.mubr.msk.f32.mxu0 %vm2258_vm0, %v2259_v3 }
 0x18a   :  { %v2254_v25 = vpop.eup %2253  ;;  %2185 = vmatpush3.bf16.msra.mxu0 %v2184_v23  ;;  %v2208_v23 = vpack.c.bf16 %v1785_v19, %v1784_v18  ;;  %v1816_v19 = vld [vmem:[%s2704_s9 + $0x3] ss:$0 sm:$0xff] }
 0x18b   :  { %v2503_v28 = vmul.f32 %v2254_v25, %v2415_v26  ;;  %v439_v26 = vld [vmem:[%s2703_s8] sm:$0xff] }
 0x18d   :  { %1979 = vmatmul.mubr.msk.f32.vlgmr.msra.gmra.mrb[6].mxu1 %vm218_vm14, %v2503_v28 }
 0x18e   :  { %v2256_v32 = vpop.eup %2255  ;;  %2164 = vmatpush3.bf16.msra.mxu1 %v2161_v57  ;;  %1989 = vmatprep.mubr.msk.f32.mxu1 %vm528_vm15, %v2437_v40 }
 0x18f   :  { %2166 = vmatprep.subr.bf16.mxu1 %v2165_v30  ;;  %v2510_v33 = vmul.f32 %v2256_v32, %v2423_v31  ;;  %v440_v31 = vld [vmem:[%s2703_s8 + $0x8] sm:$0xff] }
 0x190   :  { %v2169_v34 = vpack.c.bf16 %v440_v31, %v439_v26 }
 0x191   :  { %2014 = vmatmul.mubr.msk.f32.gmra.mrb[14].mxu0 %vm231_vm13, %v2510_v33 }
 0x192   :  { %2168 = vmatpush3.bf16.msra.mxu1 %v2165_v30  ;;  %2024 = vmatprep.mubr.msk.f32.mxu0 %vm2258_vm0, %v2259_v3  ;;  %v1781_v30 = vld [vmem:[%s2704_s9 + $0x1] ss:$0 sm:$0xff] }
 0x193   :  { %2170 = vmatprep.subr.bf16.mxu1 %v2169_v34 }
 0x195   :  { %1990 = vmatmul.mubr.msk.f32.vlgmr.msra.gmra.mrb[8].mxu1 %vm528_vm15, %v2435_v39  ;;  %2025 = vmatmul.mubr.msk.f32.vlgmr.msra.gmra.mrb[16].mxu0 %vm528_vm15, %v2447_v47  ;;  %v1765_v47 = vld [vmem:[%s2703_s8 + $0x50] sm:$0xff] }
 0x196   :  { %2027 = vmatprep.mubr.msk.f32.mxu0 %vm2258_vm0, %v2259_v3  ;;  %2172 = vmatpush3.bf16.msra.mxu1 %v2169_v34 }
 0x197   :  { %2174 = vmatprep.subr.bf16.mxu1 %v2173_v37 }
 0x199   :  { %2028 = vmatmul.mubr.msk.f32.gmra.mrb[18].mxu0 %vm528_vm15, %v2449_v48  ;;  %v1766_v48 = vld [vmem:[%s2703_s8 + $0x58] sm:$0xff] }
 0x19a   :  { %2030 = vmatprep.mubr.msk.f32.mxu0 %vm2258_vm0, %v2259_v3  ;;  %2176 = vmatpush3.bf16.msra.mxu1 %v2173_v37  ;;  %v2190_v52 = vpack.c.bf16 %v1766_v48, %v1765_v47  ;;  %v1804_v47 = vld [vmem:[%s2703_s8 + $0xf0] sm:$0xff]  ;;  %v1805_v48 = vld [vmem:[%s2703_s8 + $0xf8] sm:$0xff] }
 0x19b   :  { %2186 = vmatprep.subr.bf16.mxu1 %v2257_v1 }
 0x19d   :  { %2031 = vmatmul.mubr.msk.f32.gmra.mrb[20].mxu0 %vm528_vm15, %v2457_v53 }
 0x19e   :  { %2056 = vmatprep.mubr.msk.f32.mxu0 %vm218_vm14, %v228_v24 }
 0x257   :  { %v786_v38 = vpop.f32.mrb[10].mxu0 }
 0x258   :  { %v2009_v39 = vpop.f32.mrb[11].mxu0 }
 0x25b   :  { %v791_v40 = vpop.f32.mrb[12].mxu0 }
 0x25c   :  { %v2012_v41 = vpop.f32.mrb[13].mxu0 }
 0x260   :  { %v1980_v44 = vpop.f32.mrb[6].mxu1 }
 0x261   :  { %v519_v46 = vpop.f32.mrb[7].mxu1 }
 0x262   :  { %2000 = vmatprep.mubr.msk.f32.mxu1 %vm528_vm15, %v519_v46 }
 0x263   :  { %2001 = vmatmul.mubr.msk.f32.vlgmr.msra.gmra.mrb[8].mxu1 %vm528_vm15, %v1980_v44  ;;  %v1802_v44 = vld [vmem:[%s2703_s8 + $0xe0] sm:$0xff] }
 0x264   :  { %2188 = vmatpush3.bf16.msra.mxu1 %v2187_v45  ;;  %v796_v51 = vpop.f32.mrb[14].mxu0  ;;  %2041 = vmatprep.mubr.msk.f32.mxu1 %vm2258_vm0, %v2259_v3  ;;  %v1803_v45 = vld [vmem:[%s2703_s8 + $0xe8] sm:$0xff] }
 0x265   :  { %v2015_v53 = vpop.f32.mrb[15].mxu0  ;;  %2189 = vmatprep.subr.bf16.mxu1 %v2257_v1  ;;  %v2216_v46 = vpack.c.bf16 %v1803_v45, %v1802_v44 }
 0x268   :  { %2191 = vmatpush3.bf16.msra.mxu1 %v2190_v52  ;;  %v875_v55 = vpop.f32.mrb[16].mxu0  ;;  %v1801_v52 = vld [vmem:[%s2703_s8 + $0xd8] sm:$0xff] }
 0x269   :  { %v2026_v56 = vpop.f32.mrb[17].mxu0  ;;  %2197 = vmatprep.subr.bf16.mxu1 %v2196_v54 }
 0x26b   :  { %2042 = vmatmul.mubr.msk.f32.vlgmr.msra.gmra.mrb[10].mxu1 %vm528_vm15, %v786_v38 }
 0x26c   :  { %v880_v57 = vpop.f32.mrb[18].mxu0  ;;  %2044 = vmatprep.mubr.msk.f32.mxu1 %vm2258_vm0, %v2259_v3  ;;  %2199 = vmatpush3.bf16.msra.mxu1 %v2196_v54 }
 0x26d   :  { %v2029_v58 = vpop.f32.mrb[19].mxu0  ;;  %2201 = vmatprep.subr.bf16.mxu1 %v2200_v63 }
 0x26f   :  { %2045 = vmatmul.mubr.msk.f32.gmra.mrb[12].mxu1 %vm528_vm15, %v791_v40 }
 0x270   :  { %v885_v59 = vpop.f32.mrb[20].mxu0  ;;  %2047 = vmatprep.mubr.msk.f32.mxu1 %vm2258_vm0, %v2259_v3  ;;  %2203 = vmatpush3.bf16.msra.mxu1 %v2200_v63 }
 0x271   :  { %v2032_v60 = vpop.f32.mrb[21].mxu0  ;;  %2205 = vmatprep.subr.bf16.mxu1 %v2204_v9 }
 0x273   :  { %2048 = vmatmul.mubr.msk.f32.gmra.mrb[14].mxu1 %vm528_vm15, %v796_v51  ;;  %v1800_v51 = vld [vmem:[%s2703_s8 + $0xd0] sm:$0xff] }
 0x274   :  { %v2225_v54 = vpack.c.bf16 %v1801_v52, %v1800_v51 }
 0x336   :  { %v2002_v13 = vpop.f32.mrb[8].mxu1 }
 0x337   :  { %v699_v14 = vadd.f32 %v2002_v13, %v1762_v10  ;;  %v682_v15 = vpop.f32.mrb[9].mxu1 }
 0x338   :  { %v698_v17 = vadd.f32 %v1762_v10, %v682_v15  ;;  %v1797_v10 = vld [vmem:[%s2704_s9 + $0x2] ss:$0 sm:$0xff] }
 0x339   :  { %v701_v20 = vmax.f32 %v699_v14, 0.0 }
 0x33a   :  { %v700_v21 = vmax.f32 %v698_v17, 0.0 }
 0x33c   :  { %v2213_v24 = vpack.c.bf16 %v701_v20, %v700_v21  ;;  %2067 = vmatprep.mubr.msk.f32.mxu1 %vm528_vm15, %v700_v21 }
 0x33d   :  { %2068 = vmatmul.mubr.msk.f32.vlgmr.msra.gmra.mrb[16].mxu1 %vm528_vm15, %v701_v20 }
 0x33e   :  { %v964_v27 = vpop.f32.mrb[10].mxu1  ;;  %2207 = vmatpush3.bf16.msra.mxu1 %v2204_v9  ;;  %v1540_v9 = vrot.slane %v1526_v4, %v52_v6 }
 0x33f   :  { %v965_v29 = vadd.f32 %v964_v27, %v875_v55  ;;  %v2043_v25 = vpop.f32.mrb[11].mxu1  ;;  %2209 = vmatprep.subr.bf16.mxu1 %v2208_v23 }
 0x340   :  { %vm1541_vm1 = vcmp.eq.s32.totalorder %v2319_v2, %v1540_v9  ;;  %vm1542_vm2 = vcmp.eq.s32.totalorder %v2327_v5, %v1540_v9  ;;  %vm1543_vm4 = vcmp.eq.s32.totalorder %v2332_v8, %v1540_v9 }
 0x341   :  { %v986_v26 = vadd.f32 %v1781_v30, %v965_v29  ;;  %vm2233_vm3 = vmpackc.low %vm1542_vm2, %vm1541_vm1 }
 0x342   :  { %v969_v32 = vpop.f32.mrb[12].mxu1  ;;  %2211 = vmatpush3.bf16.msra.mxu1 %v2208_v23 }
 0x343   :  { %v970_v31 = vadd.f32 %v969_v32, %v880_v57  ;;  %v2046_v34 = vpop.f32.mrb[13].mxu1  ;;  %2221 = vmatprep.subr.bf16.mxu1 %v2257_v1  ;;  %v989_v37 = vmax.f32 %v986_v26, 0.0 }
 0x345   :  { %v987_v35 = vadd.f32 %v1781_v30, %v970_v31 }
 0x346   :  { %v974_v36 = vpop.f32.mrb[14].mxu1 }
 0x347   :  { %v990_v38 = vmax.f32 %v987_v35, 0.0  ;;  %v975_v39 = vadd.f32 %v974_v36, %v885_v59  ;;  %v2049_v40 = vpop.f32.mrb[15].mxu1  ;;  %v1530_v35 = vrot.slane %v1526_v4, %v41_v7 }
 0x349   :  { %v988_v41 = vadd.f32 %v1781_v30, %v975_v39  ;;  %v2192_v42 = vpack.c.bf16 %v990_v38, %v989_v37  ;;  %vm1532_vm5 = vcmp.eq.s32.totalorder %v2327_v5, %v1530_v35  ;;  %vm1531_vm6 = vcmp.eq.s32.totalorder %v2319_v2, %v1530_v35 }
 0x34a   :  { %v1818_v36 = vsel %vm1532_vm5, 1.0, %v2259_v3  ;;  %v1817_v8 = vsel %vm1531_vm6, 1.0, %v2259_v3 }
 0x34b   :  { %v991_v43 = vmax.f32 %v988_v41, 0.0  ;;  %2193 = vmatprep.subr.bf16.mxu0 %v2192_v42 }
 0x34c   :  { %2195 = vmatpush3.bf16.msra.mxu0 %v2192_v42 }
 0x34d   :  { %2054 = vmatprep.subr.mxu0 %v991_v43 }
 0x350   :  { %2055 = vmatpush3.msra.mxu0 %v991_v43 }
 0x351   :  { %2057 = vmatmul.mubr.msk.f32.vlgmr.msra.gmra.mrb[22].mxu0 %vm218_vm14, %v2503_v28  ;;  %2212 = vmatprep.subr.bf16.mxu0 %v2257_v1  ;;  %v2219_v28 = vpack.c.bf16 %v1805_v48, %v1804_v47 }
 0x352   :  { %2214 = vmatpush3.bf16.msra.mxu0 %v2213_v24  ;;  %2085 = vmatprep.mubr.msk.f32.mxu0 %vm2258_vm0, %v2259_v3 }
 0x353   :  { %2215 = vmatprep.subr.bf16.mxu0 %v2257_v1 }
 0x355   :  { %2086 = vmatmul.mubr.msk.f32.vlgmr.msra.gmra.mrb[24].mxu0 %vm231_vm13, %v2474_v16  ;;  %v1798_v16 = vld [vmem:[%s2703_s8 + $0xc0] sm:$0xff] }
 0x356   :  { %2088 = vmatprep.mubr.msk.f32.mxu0 %vm2258_vm0, %v2259_v3  ;;  %2217 = vmatpush3.bf16.msra.mxu0 %v2216_v46 }
 0x357   :  { %2218 = vmatprep.subr.bf16.mxu0 %v2257_v1 }
 0x359   :  { %2089 = vmatmul.mubr.msk.f32.gmra.mrb[26].mxu0 %vm231_vm13, %v2487_v22  ;;  %v1799_v22 = vld [vmem:[%s2703_s8 + $0xc8] sm:$0xff] }
 0x35a   :  { %2091 = vmatprep.mubr.msk.f32.mxu0 %vm2258_vm0, %v2259_v3  ;;  %2220 = vmatpush3.bf16.msra.mxu0 %v2219_v28  ;;  %v2222_v49 = vpack.c.bf16 %v1799_v22, %v1798_v16 }
 0x35d   :  { %2092 = vmatmul.mubr.msk.f32.gmra.mrb[28].mxu0 %vm231_vm13, %v2510_v33 }
 0x35e   :  { %2102 = vmatprep.mubr.msk.f32.mxu0 %vm2258_vm0, %v2259_v3 }
 0x361   :  { %2103 = vmatmul.mubr.msk.f32.vlgmr.msra.gmra.mrb[30].mxu0 %vm528_vm15, %v989_v37 }
 0x362   :  { %2105 = vmatprep.mubr.msk.f32.mxu0 %vm2258_vm0, %v2259_v3 }
 0x365   :  { %2106 = vmatmul.mubr.msk.f32.gmra.mrb[32].mxu0 %vm528_vm15, %v990_v38 }
 0x366   :  { %2108 = vmatprep.mubr.msk.f32.mxu0 %vm2258_vm0, %v2259_v3 }
 0x369   :  { %2109 = vmatmul.mubr.msk.f32.gmra.mrb[34].mxu0 %vm528_vm15, %v991_v43 }
 0x424   :  { %v2058_v33 = vpop.f32.mrb[22].mxu0 }
 0x425   :  { %v1067_v50 = vpop.f32.mrb[23].mxu0 }
 0x426   :  { %2078 = vmatprep.mubr.msk.f32.mxu1 %vm528_vm15, %v1067_v50 }
 0x427   :  { %2079 = vmatmul.mubr.msk.f32.vlgmr.msra.gmra.mrb[16].mxu1 %vm528_vm15, %v2058_v33 }
 0x428   :  { %2223 = vmatpush3.bf16.msra.mxu1 %v2222_v49  ;;  %v1323_v53 = vpop.f32.mrb[24].mxu0  ;;  %2119 = vmatprep.mubr.msk.f32.mxu1 %vm2258_vm0, %v2259_v3 }
 0x429   :  { %v2087_v55 = vpop.f32.mrb[25].mxu0  ;;  %2224 = vmatprep.subr.bf16.mxu1 %v2257_v1 }
 0x42c   :  { %2226 = vmatpush3.bf16.msra.mxu1 %v2225_v54  ;;  %v1328_v56 = vpop.f32.mrb[26].mxu0 }
 0x42d   :  { %v2090_v57 = vpop.f32.mrb[27].mxu0  ;;  %2234 = vmatprep.subr.msk.bf16.mxu1 %vm2233_vm3, %v2261_v12 }
 0x42f   :  { %2120 = vmatmul.mubr.msk.f32.vlgmr.msra.gmra.mrb[18].mxu1 %vm528_vm15, %v1323_v53 }
 0x430   :  { %v1333_v58 = vpop.f32.mrb[28].mxu0  ;;  %2122 = vmatprep.mubr.msk.f32.mxu1 %vm2258_vm0, %v2259_v3  ;;  %2236 = vmatpush3.bf16.msk.msra.mxu1 %vm2233_vm3, %v2261_v12 }
 0x431   :  { %v2093_v59 = vpop.f32.mrb[29].mxu0  ;;  %2141 = vmatprep.subr.msk.mxu1 %vm1543_vm4, %v2260_v11 }
 0x433   :  { %2123 = vmatmul.mubr.msk.f32.gmra.mrb[20].mxu1 %vm528_vm15, %v1328_v56 }
 0x434   :  { %v1412_v60 = vpop.f32.mrb[30].mxu0  ;;  %2125 = vmatprep.mubr.msk.f32.mxu1 %vm2258_vm0, %v2259_v3  ;;  %vm2228_vm0 = vmpackc.low %vm528_vm15, %vm528_vm15  ;;  %2142 = vmatpush3.msk.msra.mxu1 %vm1543_vm4, %v2260_v11 }
 0x435   :  { %v2104_v61 = vpop.f32.mrb[31].mxu0 }
 0x437   :  { %2126 = vmatmul.mubr.msk.f32.gmra.mrb[22].mxu1 %vm528_vm15, %v1333_v58 }
 0x438   :  { %v1417_v1 = vpop.f32.mrb[32].mxu0 }
 0x439   :  { %v2107_v62 = vpop.f32.mrb[33].mxu0 }
 0x43c   :  { %v1422_v63 = vpop.f32.mrb[34].mxu0 }
 0x43d   :  { %v2110_v0 = vpop.f32.mrb[35].mxu0 }
 0x4fa   :  { %v2080_v13 = vpop.f32.mrb[16].mxu1 }
 0x4fb   :  { %v1229_v14 = vpop.f32.mrb[17].mxu1  ;;  %v1247_v26 = vadd.f32 %v2080_v13, %v1797_v10 }
 0x4fc   :  { %v1246_v15 = vadd.f32 %v1797_v10, %v1229_v14 }
 0x4fe   :  { %2134 = vmatprep.mubr.msk.f32.mxu0 %vm528_vm15, %v1246_v15 }
 0x502   :  { %v1501_v17 = vpop.f32.mrb[18].mxu1 }
 0x503   :  { %v1502_v6 = vadd.f32 %v1501_v17, %v1412_v60  ;;  %v2121_v18 = vpop.f32.mrb[19].mxu1 }
 0x505   :  { %v1523_v12 = vadd.f32 %v1816_v19, %v1502_v6 }
 0x506   :  { %v1506_v20 = vpop.f32.mrb[20].mxu1 }
 0x507   :  { %v1507_v21 = vadd.f32 %v1506_v20, %v1417_v1  ;;  %v2124_v23 = vpop.f32.mrb[21].mxu1 }
 0x509   :  { %v1524_v24 = vadd.f32 %v1816_v19, %v1507_v21 }
 0x50a   :  { %v1511_v27 = vpop.f32.mrb[22].mxu1 }
 0x50b   :  { %v2227_v29 = vpack.c.bf16 %v1524_v24, %v1523_v12  ;;  %v1512_v25 = vadd.f32 %v1511_v27, %v1422_v63  ;;  %v2127_v30 = vpop.f32.mrb[23].mxu1 }
 0x50d   :  { %v1525_v32 = vadd.f32 %v1816_v19, %v1512_v25  ;;  %2229 = vmatprep.subr.msk.bf16.mxu0 %vm2228_vm0, %v2227_v29 }
 0x50e   :  { %2232 = vmatpush3.bf16.xpose.msk.msra.mxu0 %vm2228_vm0, %v2227_v29 }
 0x50f   :  { %2132 = vmatprep.subr.msk.mxu0 %vm528_vm15, %v1525_v32 }
 0x516   :  { %2133 = vmatpush3.xpose.msk.msra.mxu0 %vm528_vm15, %v1525_v32 }
 0x519   :  { %2135 = vmatmul.mubr.msk.f32.vlgmr.msra.gmra.mrb[36].mxu0 %vm528_vm15, %v1247_v26 }
 0x5ec   :  { %v2136_v31 = vpop.f32.mrb[36].mxu0 }
 0x5ed   :  { %v1631_v34 = vpop.f32.mrb[37].mxu0 }
 0x5ee   :  { %2143 = vmatprep.mubr.msk.f32.mxu1 %vm218_vm14, %v1631_v34 }
 0x5ef   :  { %2144 = vmatmul.mubr.msk.f32.vlgmr.msra.gmra.mrb[24].mxu1 %vm218_vm14, %v2136_v31 }
 0x6c2   :  { %v2145_v37 = vpop.f32.mrb[24].mxu1 }
 0x6c3   :  { %v1722_v38 = vmul.f32 %v2145_v37, %v1818_v36  ;;  %v1712_v11 = vpop.f32.mrb[25].mxu1 }
 0x6c4   :  { %v1721_v39 = vmul.f32 %v1817_v8, %v1712_v11 }
 0x6c6   :  { %v1723_v40 = vadd.f32 %v1722_v38, %v1721_v39 }
 0x6c8   :  { %v1724_v41 = vrot.slane %v1723_v40, 4 }
 0x6ca   :  { %v1725_v42 = vadd.f32 %v1724_v41, %v1723_v40 }
 0x6cc   :  { %v1726_v43 = vrot.slane %v1725_v42, 2 }
 0x6ce   :  { %v1727_v44 = vadd.f32 %v1726_v43, %v1725_v42 }
 0x6d0   :  { %v1728_v45 = vrot.slane %v1727_v44, 1 }
 0x6d2   :  { %v1729_v46 = vadd.f32 %v1728_v45, %v1727_v44 }
 0x6d4   :  { %1730 = vst [vmem:[%s2706_s10] sm:$0x1] %v1729_v46 }

</bundles_post_ra>
